<compile_context>
chip_gen: v6e
topology: v6e:2x2x1
jax: 0.10.0
libtpu: 0.0.40
codegen_flags: <defaults>
</compile_context>

<pallas_src>
import functools

import jax
import jax.numpy as jnp
from jax.experimental import pallas as pl
from jax.experimental.pallas import tpu as pltpu


def _round_up(x, m):
    return ((x + m - 1) // m) * m


def _row_softmax(x_tile, wk_t):
    """softmax over the last axis of (x_tile @ wk_t); matmul accumulates in f32."""
    logits = jnp.dot(x_tile, wk_t, preferred_element_type=jnp.float32)
    m = jnp.max(logits, axis=-1, keepdims=True)
    e = jnp.exp(logits - m)
    return e / jnp.sum(e, axis=-1, keepdims=True)


def _fused_kernel(x_ref, wk_ref, wv_ref, o_ref, *scratch,
                  resident, num_tiles, rows_valid_last):
    """grid = (phase, tile).

    phase 0: attn = softmax_rows(x @ WkT); accumulate colsum over N
             (attn kept in VMEM scratch in the resident variant).
    phase 1: out = (attn / colsum) @ WvT   (softmax recomputed from x in the
             non-resident fallback).
    """
    if resident:
        attn_scr, colsum_scr, inv_scr = scratch
    else:
        colsum_scr, inv_scr = scratch
        attn_scr = None

    p = pl.program_id(0)
    i = pl.program_id(1)

    @pl.when(p == 0)
    def _phase0():
        @pl.when(i == 0)
        def _():
            colsum_scr[...] = jnp.zeros_like(colsum_scr)

        attn = _row_softmax(x_ref[...], wk_ref[...])

        def commit(a):
            if resident:
                attn_scr[i] = a
            colsum_scr[...] += jnp.sum(a, axis=0, keepdims=True)

        if rows_valid_last is None:
            # N is a multiple of the tile: no padding mask anywhere.
            commit(attn)
        else:
            # Only the last row tile can contain padded rows; mask them to zero
            # so the dim=0 (column) sum matches PyTorch exactly.
            @pl.when(i < num_tiles - 1)
            def _():
                commit(attn)

            @pl.when(i == num_tiles - 1)
            def _():
                r = jax.lax.broadcasted_iota(jnp.int32, attn.shape, 0)
                commit(jnp.where(r < rows_valid_last, attn, 0.0))

    @pl.when(p == 1)
    def _phase1():
        @pl.when(i == 0)
        def _():
            # Exact reciprocal, computed once per call (hoisted out of the
            # per-tile path).
            inv_scr[...] = 1.0 / colsum_scr[...]

        if resident:
            a = attn_scr[i]
        else:
            a = _row_softmax(x_ref[...], wk_ref[...])
        a = a * inv_scr[...]                      # broadcast (1, S) over rows
        out = jnp.dot(a, wv_ref[...], preferred_element_type=jnp.float32)
        o_ref[...] = out.astype(o_ref.dtype)


def external_attention_forward(x, wk, wv, *, block_rows=1024,
                               attn_resident=None,
                               vmem_budget_bytes=36 << 20):
    """ExternalAttention forward.

    x:  (N, d_model)
    wk: (S, d_model)   -- mk.weight in PyTorch (out, in) layout
    wv: (d_model, S)   -- mv.weight in PyTorch (out, in) layout
    returns (N, d_model)
    """
    N, d_model = x.shape
    S = wk.shape[0]
    wk_t = wk.T      # (d_model, S)
    wv_t = wv.T      # (S, d_model)

    # Row tile: large tiles amortize per-step overhead; multiple of 8 sublanes.
    tb = _round_up(min(block_rows, _round_up(N, 8)), 8)
    n_pad = _round_up(N, tb)
    x_p = jnp.pad(x, ((0, n_pad - N), (0, 0))) if n_pad != N else x
    num_tiles = n_pad // tb

    # Lane-padded VMEM footprints (S=32 < 128 lanes -> 4x padding on attn).
    attn_scr_bytes = num_tiles * tb * _round_up(S, 128) * 4
    tile_bytes = tb * _round_up(d_model, 128) * 4
    weight_bytes = (_round_up(d_model, 8) * _round_up(S, 128)
                    + _round_up(S, 8) * _round_up(d_model, 128)) * 4
    base_bytes = 4 * tile_bytes + 2 * weight_bytes + (1 << 20)

    if attn_resident is None:
        attn_resident = (attn_scr_bytes + base_bytes) <= vmem_budget_bytes

    rows_valid_last = None if n_pad == N else (N - (num_tiles - 1) * tb)

    scratch_shapes = [pltpu.VMEM((1, S), jnp.float32),   # colsum accumulator
                      pltpu.VMEM((1, S), jnp.float32)]   # 1/colsum
    if attn_resident:
        scratch_shapes = ([pltpu.VMEM((num_tiles, tb, S), jnp.float32)]
                          + scratch_shapes)
        x_map = lambda p, i: (i * (1 - p), 0)   # stream in phase 0, park after
        vmem_needed = attn_scr_bytes + base_bytes
    else:
        x_map = lambda p, i: (i, 0)             # stream in both phases
        vmem_needed = base_bytes

    params = {"dimension_semantics": ("arbitrary", "arbitrary")}
    if vmem_needed > (24 << 20):
        params["vmem_limit_bytes"] = min(int(vmem_needed * 5 // 4) + (4 << 20),
                                         100 << 20)

    out = pl.pallas_call(
        functools.partial(_fused_kernel, resident=attn_resident,
                          num_tiles=num_tiles,
                          rows_valid_last=rows_valid_last),
        out_shape=jax.ShapeDtypeStruct((n_pad, d_model), x.dtype),
        grid=(2, num_tiles),
        in_specs=[
            pl.BlockSpec((tb, d_model), x_map),                 # x tiles
            pl.BlockSpec((d_model, S), lambda p, i: (0, 0)),    # WkT resident
            pl.BlockSpec((S, d_model), lambda p, i: (0, 0)),    # WvT resident
        ],
        # Block 0 for all of phase 0 (no writebacks / no garbage stores),
        # block i during phase 1 (lane-dense stores, written exactly once).
        out_specs=pl.BlockSpec((tb, d_model), lambda p, i: (i * p, 0)),
        scratch_shapes=scratch_shapes,
        compiler_params=pltpu.CompilerParams(**params),
    )(x_p, wk_t, wv_t)

    return out[:N]


def reference_forward(x, wk, wv):
    """Pure-JAX reference mirroring the PyTorch module exactly."""
    attn = x @ wk.T
    attn = jax.nn.softmax(attn, axis=1)
    attn = attn / jnp.sum(attn, axis=0, keepdims=True)
    return attn @ wv.T


if __name__ == "__main__":
    # Small shapes consistent with the module: d_model=128, S=32.
    # N=72 (not a multiple of the row tile) exercises padding + masking;
    # block_rows=32 forces multiple grid tiles.
    N, d_model, S = 72, 128, 32

    key = jax.random.PRNGKey(0)
    kx, kk, kv = jax.random.split(key, 3)

    x = jax.random.normal(kx, (N, d_model), dtype=jnp.float32)
    # Module init is normal(std=0.001); use a larger std here so the numerical
    # correctness check is meaningful (outputs are not ~0).
    wk = 0.1 * jax.random.normal(kk, (S, d_model), dtype=jnp.float32)   # mk.weight
    wv = 0.1 * jax.random.normal(kv, (d_model, S), dtype=jnp.float32)   # mv.weight

    ref = reference_forward(x, wk, wv)

    # Fused kernel, attn resident in VMEM scratch (default path).
    out = jax.block_until_ready(
        external_attention_forward(x, wk, wv, block_rows=32))
    assert out.shape == (N, d_model)
    assert jnp.allclose(out, ref, rtol=1e-4, atol=1e-5), float(
        jnp.max(jnp.abs(out - ref)))

    # Recompute fallback (used automatically for very large N / v7x VMEM cap).
    out2 = jax.block_until_ready(
        external_attention_forward(x, wk, wv, block_rows=32,
                                   attn_resident=False))
    assert jnp.allclose(out2, ref, rtol=1e-4, atol=1e-5), float(
        jnp.max(jnp.abs(out2 - ref)))

    print("KERNEL_OK")
</pallas_src>

<mosaic_0001>
module attributes {stable_mosaic.version = 11 : i64} {
  func.func @_fused_kernel(%arg0: i32, %arg1: i32, %arg2: memref<32x128xf32, #tpu.memory_space<vmem>>, %arg3: memref<128x32xf32, #tpu.memory_space<vmem>>, %arg4: memref<32x128xf32, #tpu.memory_space<vmem>>, %arg5: memref<32x128xf32, #tpu.memory_space<vmem>>, %arg6: memref<3x32x32xf32, #tpu.memory_space<vmem>>, %arg7: memref<1x32xf32, #tpu.memory_space<vmem>>, %arg8: memref<1x32xf32, #tpu.memory_space<vmem>>) attributes {dimension_semantics = [#tpu.dimension_semantics<arbitrary>, #tpu.dimension_semantics<arbitrary>], iteration_bounds = array<i64: 2, 3>, scalar_prefetch = 0 : i64, scratch_operands = 3 : i64, tpu.core_type = #tpu.core_type<tc>, window_params = [{transform_indices = @transform_0, window_bounds = array<i64: 32, 128>}, {pipeline_mode = #tpu.pipeline_mode<synchronous>, transform_indices = @transform_1, window_bounds = array<i64: 128, 32>}, {pipeline_mode = #tpu.pipeline_mode<synchronous>, transform_indices = @transform_2, window_bounds = array<i64: 32, 128>}, {transform_indices = @transform_3, window_bounds = array<i64: 32, 128>}]} {
    %c0_i32 = arith.constant 0 : i32
    %0 = arith.cmpi eq, %arg0, %c0_i32 : i32
    %1 = arith.extui %0 : i1 to i32
    %c0_i32_0 = arith.constant 0 : i32
    %2 = arith.cmpi ne, %1, %c0_i32_0 : i32
    scf.if %2 {
      %c0_i32_2 = arith.constant 0 : i32
      %6 = arith.cmpi eq, %arg1, %c0_i32_2 : i32
      %7 = arith.extui %6 : i1 to i32
      %c0_i32_3 = arith.constant 0 : i32
      %8 = arith.cmpi ne, %7, %c0_i32_3 : i32
      scf.if %8 {
        %cst_12 = arith.constant 0.000000e+00 : f32
        %27 = vector.broadcast %cst_12 : f32 to vector<1x32xf32>
        %c0_13 = arith.constant 0 : index
        %c0_14 = arith.constant 0 : index
        %28 = vector.load %arg7[%c0_13, %c0_14] : memref<1x32xf32, #tpu.memory_space<vmem>>, vector<1x32xf32>
        tpu.vector_store %arg7[%c0_13, %c0_14], %27 {strides = array<i32>} : memref<1x32xf32, #tpu.memory_space<vmem>>, vector<1x32xf32>,
      } else {
      }
      %c0 = arith.constant 0 : index
      %c0_4 = arith.constant 0 : index
      %9 = vector.load %arg2[%c0, %c0_4] : memref<32x128xf32, #tpu.memory_space<vmem>>, vector<32x128xf32>
      %c0_5 = arith.constant 0 : index
      %c0_6 = arith.constant 0 : index
      %10 = vector.load %arg3[%c0_5, %c0_6] : memref<128x32xf32, #tpu.memory_space<vmem>>, vector<128x32xf32>
      %cst = arith.constant dense<0.000000e+00> : vector<32x32xf32>
      %11 = tpu.matmul %9, %10, %cst {dimension_numbers = #tpu.dot_dimension_numbers<[1], [0], [0], [1], [0, 0, 1, 1], [], []>} : vector<32x128xf32>, vector<128x32xf32>, vector<32x32xf32> -> vector<32x32xf32>
      %cst_7 = arith.constant dense<0xFF800000> : vector<32xf32>
      %12 = vector.multi_reduction <maximumf>, %11, %cst_7 [1] : vector<32x32xf32> to vector<32xf32>
      %13 = vector.shape_cast %12 : vector<32xf32> to vector<32x1xf32>
      %14 = vector.broadcast %13 : vector<32x1xf32> to vector<32x32xf32>
      %15 = arith.subf %11, %14 : vector<32x32xf32>
      %16 = math.exp %15 : vector<32x32xf32>
      %cst_8 = arith.constant dense<0.000000e+00> : vector<32xf32>
      %17 = vector.multi_reduction <add>, %16, %cst_8 [1] : vector<32x32xf32> to vector<32xf32>
      %18 = vector.shape_cast %17 : vector<32xf32> to vector<32x1xf32>
      %19 = vector.broadcast %18 : vector<32x1xf32> to vector<32x32xf32>
      %20 = arith.divf %16, %19 : vector<32x32xf32>
      %c2_i32 = arith.constant 2 : i32
      %21 = arith.cmpi slt, %arg1, %c2_i32 : i32
      %22 = arith.extui %21 : i1 to i32
      %c0_i32_9 = arith.constant 0 : i32
      %23 = arith.cmpi ne, %22, %c0_i32_9 : i32
      scf.if %23 {
        %27 = arith.index_cast %arg1 : i32 to index
        %c0_12 = arith.constant 0 : index
        %c0_13 = arith.constant 0 : index
        %28 = vector.load %arg6[%27, %c0_12, %c0_13] : memref<3x32x32xf32, #tpu.memory_space<vmem>>, vector<1x32x32xf32>
        %29 = vector.shape_cast %28 : vector<1x32x32xf32> to vector<32x32xf32>
        %30 = vector.shape_cast %20 : vector<32x32xf32> to vector<1x32x32xf32>
        tpu.vector_store %arg6[%27, %c0_12, %c0_13], %30 {strides = array<i32>} : memref<3x32x32xf32, #tpu.memory_space<vmem>>, vector<1x32x32xf32>,
        %c0_14 = arith.constant 0 : index
        %c0_15 = arith.constant 0 : index
        %31 = vector.load %arg7[%c0_14, %c0_15] : memref<1x32xf32, #tpu.memory_space<vmem>>, vector<1x32xf32>
        %cst_16 = arith.constant dense<0.000000e+00> : vector<32xf32>
        %32 = vector.multi_reduction <add>, %20, %cst_16 [0] : vector<32x32xf32> to vector<32xf32>
        %33 = vector.shape_cast %32 : vector<32xf32> to vector<1x32xf32>
        %34 = arith.addf %31, %33 : vector<1x32xf32>
        %c0_17 = arith.constant 0 : index
        %c0_18 = arith.constant 0 : index
        %35 = vector.load %arg7[%c0_17, %c0_18] : memref<1x32xf32, #tpu.memory_space<vmem>>, vector<1x32xf32>
        tpu.vector_store %arg7[%c0_17, %c0_18], %34 {strides = array<i32>} : memref<1x32xf32, #tpu.memory_space<vmem>>, vector<1x32xf32>,
      } else {
      }
      %c2_i32_10 = arith.constant 2 : i32
      %24 = arith.cmpi eq, %arg1, %c2_i32_10 : i32
      %25 = arith.extui %24 : i1 to i32
      %c0_i32_11 = arith.constant 0 : i32
      %26 = arith.cmpi ne, %25, %c0_i32_11 : i32
      scf.if %26 {
        %27 = tpu.iota {dimensions = array<i32: 0>} : vector<32x32xi32>
        %c8_i32 = arith.constant 8 : i32
        %28 = vector.broadcast %c8_i32 : i32 to vector<32x32xi32>
        %29 = arith.cmpi slt, %27, %28 : vector<32x32xi32>
        %cst_12 = arith.constant 0.000000e+00 : f32
        %30 = vector.broadcast %cst_12 : f32 to vector<32x32xf32>
        %31 = arith.select %29, %20, %30 : vector<32x32xi1>, vector<32x32xf32>
        %32 = arith.index_cast %arg1 : i32 to index
        %c0_13 = arith.constant 0 : index
        %c0_14 = arith.constant 0 : index
        %33 = vector.load %arg6[%32, %c0_13, %c0_14] : memref<3x32x32xf32, #tpu.memory_space<vmem>>, vector<1x32x32xf32>
        %34 = vector.shape_cast %33 : vector<1x32x32xf32> to vector<32x32xf32>
        %35 = vector.shape_cast %31 : vector<32x32xf32> to vector<1x32x32xf32>
        tpu.vector_store %arg6[%32, %c0_13, %c0_14], %35 {strides = array<i32>} : memref<3x32x32xf32, #tpu.memory_space<vmem>>, vector<1x32x32xf32>,
        %c0_15 = arith.constant 0 : index
        %c0_16 = arith.constant 0 : index
        %36 = vector.load %arg7[%c0_15, %c0_16] : memref<1x32xf32, #tpu.memory_space<vmem>>, vector<1x32xf32>
        %cst_17 = arith.constant dense<0.000000e+00> : vector<32xf32>
        %37 = vector.multi_reduction <add>, %31, %cst_17 [0] : vector<32x32xf32> to vector<32xf32>
        %38 = vector.shape_cast %37 : vector<32xf32> to vector<1x32xf32>
        %39 = arith.addf %36, %38 : vector<1x32xf32>
        %c0_18 = arith.constant 0 : index
        %c0_19 = arith.constant 0 : index
        %40 = vector.load %arg7[%c0_18, %c0_19] : memref<1x32xf32, #tpu.memory_space<vmem>>, vector<1x32xf32>
        tpu.vector_store %arg7[%c0_18, %c0_19], %39 {strides = array<i32>} : memref<1x32xf32, #tpu.memory_space<vmem>>, vector<1x32xf32>,
      } else {
      }
    } else {
    }
    %c1_i32 = arith.constant 1 : i32
    %3 = arith.cmpi eq, %arg0, %c1_i32 : i32
    %4 = arith.extui %3 : i1 to i32
    %c0_i32_1 = arith.constant 0 : i32
    %5 = arith.cmpi ne, %4, %c0_i32_1 : i32
    scf.if %5 {
      %c0_i32_2 = arith.constant 0 : i32
      %6 = arith.cmpi eq, %arg1, %c0_i32_2 : i32
      %7 = arith.extui %6 : i1 to i32
      %c0_i32_3 = arith.constant 0 : i32
      %8 = arith.cmpi ne, %7, %c0_i32_3 : i32
      scf.if %8 {
        %c0_11 = arith.constant 0 : index
        %c0_12 = arith.constant 0 : index
        %18 = vector.load %arg7[%c0_11, %c0_12] : memref<1x32xf32, #tpu.memory_space<vmem>>, vector<1x32xf32>
        %cst_13 = arith.constant 1.000000e+00 : f32
        %19 = vector.broadcast %cst_13 : f32 to vector<1x32xf32>
        %20 = arith.divf %19, %18 : vector<1x32xf32>
        %c0_14 = arith.constant 0 : index
        %c0_15 = arith.constant 0 : index
        %21 = vector.load %arg8[%c0_14, %c0_15] : memref<1x32xf32, #tpu.memory_space<vmem>>, vector<1x32xf32>
        tpu.vector_store %arg8[%c0_14, %c0_15], %20 {strides = array<i32>} : memref<1x32xf32, #tpu.memory_space<vmem>>, vector<1x32xf32>,
      } else {
      }
      %9 = arith.index_cast %arg1 : i32 to index
      %c0 = arith.constant 0 : index
      %c0_4 = arith.constant 0 : index
      %10 = vector.load %arg6[%9, %c0, %c0_4] : memref<3x32x32xf32, #tpu.memory_space<vmem>>, vector<1x32x32xf32>
      %11 = vector.shape_cast %10 : vector<1x32x32xf32> to vector<32x32xf32>
      %c0_5 = arith.constant 0 : index
      %c0_6 = arith.constant 0 : index
      %12 = vector.load %arg8[%c0_5, %c0_6] : memref<1x32xf32, #tpu.memory_space<vmem>>, vector<1x32xf32>
      %13 = vector.broadcast %12 : vector<1x32xf32> to vector<32x32xf32>
      %14 = arith.mulf %11, %13 : vector<32x32xf32>
      %c0_7 = arith.constant 0 : index
      %c0_8 = arith.constant 0 : index
      %15 = vector.load %arg4[%c0_7, %c0_8] : memref<32x128xf32, #tpu.memory_space<vmem>>, vector<32x128xf32>
      %cst = arith.constant dense<0.000000e+00> : vector<32x128xf32>
      %16 = tpu.matmul %14, %15, %cst {dimension_numbers = #tpu.dot_dimension_numbers<[1], [0], [0], [1], [0, 0, 1, 1], [], []>} : vector<32x32xf32>, vector<32x128xf32>, vector<32x128xf32> -> vector<32x128xf32>
      %c0_9 = arith.constant 0 : index
      %c0_10 = arith.constant 0 : index
      %17 = vector.load %arg5[%c0_9, %c0_10] : memref<32x128xf32, #tpu.memory_space<vmem>>, vector<32x128xf32>
      tpu.vector_store %arg5[%c0_9, %c0_10], %16 {strides = array<i32>} : memref<32x128xf32, #tpu.memory_space<vmem>>, vector<32x128xf32>,
    } else {
    }
    return
  }
  func.func @transform_0(%arg0: i32, %arg1: i32) -> (i32, i32) {
    %c1_i32 = arith.constant 1 : i32
    %0 = arith.subi %c1_i32, %arg0 : i32
    %1 = arith.muli %arg1, %0 : i32
    %c0_i32 = arith.constant 0 : i32
    %c0_i32_0 = arith.constant 0 : i32
    return %1, %c0_i32 : i32, i32
  }
  func.func @transform_1(%arg0: i32, %arg1: i32) -> (i32, i32) {
    %c0_i32 = arith.constant 0 : i32
    %c0_i32_0 = arith.constant 0 : i32
    %c0_i32_1 = arith.constant 0 : i32
    return %c0_i32, %c0_i32_0 : i32, i32
  }
  func.func @transform_2(%arg0: i32, %arg1: i32) -> (i32, i32) {
    %c0_i32 = arith.constant 0 : i32
    %c0_i32_0 = arith.constant 0 : i32
    %c0_i32_1 = arith.constant 0 : i32
    return %c0_i32, %c0_i32_0 : i32, i32
  }
  func.func @transform_3(%arg0: i32, %arg1: i32) -> (i32, i32) {
    %0 = arith.muli %arg1, %arg0 : i32
    %c0_i32 = arith.constant 0 : i32
    %c0_i32_0 = arith.constant 0 : i32
    return %0, %c0_i32 : i32, i32
  }
}

</mosaic_0001>

<bundles_post_ra>
// kernel: tpu_custom_call.1
= control target key start
LH: loop header
LB: loop body
LE: loop exit
PB: predicated region body
PF: predicated region fallthrough
CT: control target
= control target key end

     0   :  { %8 = vsyncpa [#allocation6], 0  ;;  %s1262_s0 = inlined_call_operand.vmem [shape: f32[96,128], index: 0, kind: input, shape index: {}]   ;;  %s1263_s1 = inlined_call_operand.vmem [shape: f32[128,32], index: 1, kind: input, shape index: {}]   ;;  %s1264_s2 = inlined_call_operand.vmem [shape: f32[32,128], index: 2, kind: input, shape index: {}]   ;;  %s1265_s3 = inlined_call_operand.hbm [shape: f32[96,128], index: 3, kind: output, shape index: {}]  }
   0x1   :  { %10 = vsyncpa [#allocation6 + $0x1], 0  ;;  %s1018_s12 = smov 0   ;;  %s1020_s13 = smov 0  }
   0x2   :  { %s1022_s14 = smov 0   ;;  %s1024_s15 = smov 0  }
   0x3   :  { %s1026_s16 = smov 0   ;;  %s1028_s17 = smov 0  }
   0x4   :  { %s1030_s18 = smov 0   ;;  %s1032_s19 = smov 0  }
   0x5 LB: > { %s658_s20 = sadd.s32 4294967295, %s991_s19   ;;  %s659_s21 = sadd.s32 4294967294, %s991_s19   ;;  %s991_s19 = sphi %s1032_s19, %s16_s19   ;;  %s987_s18 = sphi %s1030_s18, %s1274_s18   ;;  %s983_s17 = sphi %s1028_s17, %s1273_s17   ;;  %s979_s16 = sphi %s1026_s16, %s1272_s16   ;;  %s975_s15 = sphi %s1024_s15, %s1271_s15   ;;  %s971_s14 = sphi %s1022_s14, %s1270_s14   ;;  %s967_s13 = sphi %s1020_s13, %s1269_s13   ;;  %s963_s12 = sphi %s1018_s12, %s1268_s12  }
   0x6   : > { %s25_s22 = sadd.s32 1, %s983_s17  ;;  %s28_s23 = sadd.s32 1, %s987_s18 }
   0x7   : > { %p26_p0 = scmp.ge.s32.totalorder %s25_s22, 3  ;;  %s104_s24 = smul.u32 %s983_s17, %s987_s18 }
   0x8   : > { %p119_p1 = scmp.ne.s32.totalorder %s971_s14, %s967_s13  ;;  %p120_p2 = scmp.eq.s32.totalorder %s658_s20, 5 }
   0x9   : > { %s1276_s22 = smov (%p26_p0, %s25_s22), 0  ;;  %s1278_s23 = smov (!%p26_p0, %s28_s23), %s987_s18 }
   0xa   : > { %p125_p3 = scmp.ne.s32.totalorder %s967_s13, %s963_s12  ;;  %p30_p4 = scmp.ge.s32.totalorder %s1278_s23, 2 }
   0xb   : > { %p126_p5 = scmp.eq.s32.totalorder %s659_s21, 5  ;;  %p1071_p6 = por %p120_p2, %p119_p1 }
   0xc   : > { %p662_p7 = scmp.ge.s32.totalorder %s991_s19, 1  ;;  %s1280_s23 = smov (%p30_p4, %s1278_s23), 0 }
   0xd   : > { %p1078_p8 = por %p126_p5, %p125_p3  ;;  %p163_p9 = scmp.lt.s32.totalorder %s991_s19, 7 }
   0xe   : > { %s105_s27 = smul.u32 %s1280_s23, %s1276_s22  ;;  %s109_s29 = sadd.s32 1, %s971_s14 }
   0xf   : > { %p164_p10 = pnand %p662_p7, %p163_p9 }
  0x10   : > { %s106_s28 = ssub.s32 %s104_s24, %s105_s27  ;;  %s186_s4 = sand.u32 (!%p164_p10), 1, %s967_s13  }
  0x11   : > { %p107_p11 = scmp.eq.s32.totalorder %s106_s28, 0  ;;  %167 = sbr.rel (%p164_p10) target bundleno = 888 (0x378), region = 32 }
  0x12   : > { %s189_s5 = ssub.s32 (!%p164_p10), 1, %s979_s16  ;;  %s663_s6 = sshll.u32 (!%p164_p10), %s186_s4, 5 }
  0x13   : > { %s1087_s30 = scalar_select %p107_p11, %s971_s14, %s109_s29  }
  0x14   : > { %s190_s7 = smul.u32 (!%p164_p10), %s975_s15, %s189_s5  ;;  %s1099_s21 = scalar_lea.vmem (!%p164_p10), [#allocation5], %s663_s6 }
  0x15   : > { %p666_p13 = scmp.ne.s32.totalorder (!%p164_p10), %s979_s16, 0 }
  0x16   : > { %s664_s8 = sshll.u32 %s190_s7, 2  ;;  %p667_p0 = scmp.ne.s32.totalorder (!%p666_p13), %s975_s15, 0 }
  0x17   : > { %p192_p12 = scmp.lt.s32.totalorder %s664_s8, 11  ;;  %204 = sbr.rel (%p666_p13) target bundleno = 628 (0x274), region = 36 }
  0x19   : > { %s1282_s8 = smov (!%p192_p12, %s664_s8), 11 }
  0x1a   : > { %s665_s9 = sshll.u32 %s1282_s8, 3 }
  0x1b   : > { %s1097_s20 = scalar_lea.vmem %s1262_s0, %s665_s9 }
  0x1c   : > { %208 = sbr.rel (%p667_p0) target bundleno = 35 (0x23), region = 40 }
  0x21   : > { %vm209_vm0 = vcmask 253952   ;;  %v993_v0 = vmov 0.0  }
  0x22   : > { %210 = vst.msk [vmem:[#allocation3] sm:$0x1] %vm209_vm0, %v993_v0 }
  0x23 PF: > { %v230_v1 = vld [vmem:[%s1263_s1 + $0x78] sm:$0xff]  ;;  %v229_v2 = vld [vmem:[%s1263_s1 + $0x70] sm:$0xff]  ;;  %v228_v3 = vld [vmem:[%s1263_s1 + $0x68] sm:$0xff]  ;;  %vm316_vm1 = vcmask 261120   ;;  %p668_p1 = scmp.ge.s32.totalorder %s975_s15, 2 }
  0x24   : > { %714 = vmatprep.subr.mxu0 %v230_v1  ;;  %766 = vmatprep.subr.mxu1 %v230_v1  ;;  %v227_v4 = vld [vmem:[%s1263_s1 + $0x60] sm:$0xff]  ;;  %v226_v5 = vld [vmem:[%s1263_s1 + $0x58] sm:$0xff]  ;;  %v225_v6 = vld [vmem:[%s1263_s1 + $0x50] sm:$0xff] }
  0x25   : > { %715 = vmatpush3.msra.mxu0 %v230_v1  ;;  %782 = vmatpush3.msra.mxu1 %v230_v1  ;;  %v224_v7 = vld [vmem:[%s1263_s1 + $0x48] sm:$0xff]  ;;  %v223_v8 = vld [vmem:[%s1263_s1 + $0x40] sm:$0xff]  ;;  %v222_v9 = vld [vmem:[%s1263_s1 + $0x38] sm:$0xff] }
  0x26   : > { %716 = vmatprep.subr.mxu0 %v229_v2  ;;  %767 = vmatprep.subr.mxu1 %v229_v2  ;;  %v221_v10 = vld [vmem:[%s1263_s1 + $0x30] sm:$0xff]  ;;  %v220_v11 = vld [vmem:[%s1263_s1 + $0x28] sm:$0xff]  ;;  %v219_v12 = vld [vmem:[%s1263_s1 + $0x20] sm:$0xff] }
  0x27   : > { %717 = vmatpush3.msra.mxu0 %v229_v2  ;;  %783 = vmatpush3.msra.mxu1 %v229_v2  ;;  %v218_v13 = vld [vmem:[%s1263_s1 + $0x18] sm:$0xff]  ;;  %v217_v14 = vld [vmem:[%s1263_s1 + $0x10] sm:$0xff]  ;;  %v216_v15 = vld [vmem:[%s1263_s1 + $0x8] sm:$0xff] }
  0x28   : > { %718 = vmatprep.subr.mxu0 %v228_v3  ;;  %768 = vmatprep.subr.mxu1 %v228_v3  ;;  %v215_v16 = vld [vmem:[%s1263_s1] sm:$0xff]  ;;  %v213_v18 = vld [vmem:[%s1097_s20 + $0x10] sm:$0xff]  ;;  %v212_v19 = vld [vmem:[%s1097_s20 + $0x8] sm:$0xff] }
  0x29   : > { %719 = vmatpush3.msra.mxu0 %v228_v3  ;;  %784 = vmatpush3.msra.mxu1 %v228_v3  ;;  %v211_v17 = vld [vmem:[%s1097_s20] sm:$0xff]  ;;  %v214_v20 = vld [vmem:[%s1097_s20 + $0x18] sm:$0xff]  ;;  %s669_s20 = sshll.u32 (!%p668_p1), %s975_s15, 5 }
  0x2a   : > { %720 = vmatprep.subr.mxu0 %v227_v4  ;;  %769 = vmatprep.subr.mxu1 %v227_v4  ;;  %s366_s11 = scalar_lea.vmem (!%p668_p1), [#allocation2], %s669_s20 }
  0x2b   : > { %721 = vmatpush3.msra.mxu0 %v227_v4  ;;  %785 = vmatpush3.msra.mxu1 %v227_v4 }
  0x2c   : > { %722 = vmatprep.subr.mxu0 %v226_v5  ;;  %770 = vmatprep.subr.mxu1 %v226_v5 }
  0x2d   : > { %723 = vmatpush3.msra.mxu0 %v226_v5  ;;  %786 = vmatpush3.msra.mxu1 %v226_v5 }
  0x2e   : > { %724 = vmatprep.subr.mxu0 %v225_v6  ;;  %771 = vmatprep.subr.mxu1 %v225_v6 }
  0x2f   : > { %725 = vmatpush3.msra.mxu0 %v225_v6  ;;  %787 = vmatpush3.msra.mxu1 %v225_v6 }
  0x30   : > { %726 = vmatprep.subr.mxu0 %v224_v7  ;;  %772 = vmatprep.subr.mxu1 %v224_v7 }
  0x31   : > { %727 = vmatpush3.msra.mxu0 %v224_v7  ;;  %788 = vmatpush3.msra.mxu1 %v224_v7 }
  0x32   : > { %728 = vmatprep.subr.mxu0 %v223_v8  ;;  %773 = vmatprep.subr.mxu1 %v223_v8 }
  0x33   : > { %729 = vmatpush3.msra.mxu0 %v223_v8  ;;  %789 = vmatpush3.msra.mxu1 %v223_v8 }
  0x34   : > { %730 = vmatprep.subr.mxu0 %v222_v9  ;;  %774 = vmatprep.subr.mxu1 %v222_v9 }
  0x35   : > { %731 = vmatpush3.msra.mxu0 %v222_v9  ;;  %790 = vmatpush3.msra.mxu1 %v222_v9 }
  0x36   : > { %732 = vmatprep.subr.mxu0 %v221_v10  ;;  %775 = vmatprep.subr.mxu1 %v221_v10 }
  0x37   : > { %733 = vmatpush3.msra.mxu0 %v221_v10  ;;  %791 = vmatpush3.msra.mxu1 %v221_v10 }
  0x38   : > { %734 = vmatprep.subr.mxu0 %v220_v11  ;;  %776 = vmatprep.subr.mxu1 %v220_v11 }
  0x39   : > { %735 = vmatpush3.msra.mxu0 %v220_v11  ;;  %792 = vmatpush3.msra.mxu1 %v220_v11 }
  0x3a   : > { %736 = vmatprep.subr.mxu0 %v219_v12  ;;  %777 = vmatprep.subr.mxu1 %v219_v12 }
  0x3b   : > { %737 = vmatpush3.msra.mxu0 %v219_v12  ;;  %793 = vmatpush3.msra.mxu1 %v219_v12 }
  0x3c   : > { %738 = vmatprep.subr.mxu0 %v218_v13  ;;  %778 = vmatprep.subr.mxu1 %v218_v13 }
  0x3d   : > { %739 = vmatpush3.msra.mxu0 %v218_v13  ;;  %794 = vmatpush3.msra.mxu1 %v218_v13 }
  0x3e   : > { %740 = vmatprep.subr.mxu0 %v217_v14  ;;  %779 = vmatprep.subr.mxu1 %v217_v14 }
  0x3f   : > { %741 = vmatpush3.msra.mxu0 %v217_v14  ;;  %795 = vmatpush3.msra.mxu1 %v217_v14 }
  0x40   : > { %742 = vmatprep.subr.mxu0 %v216_v15  ;;  %780 = vmatprep.subr.mxu1 %v216_v15 }
  0x41   : > { %743 = vmatpush3.msra.mxu0 %v216_v15  ;;  %796 = vmatpush3.msra.mxu1 %v216_v15 }
  0x42   : > { %744 = vmatprep.subr.mxu0 %v215_v16  ;;  %781 = vmatprep.subr.mxu1 %v215_v16 }
  0x43   : > { %745 = vmatpush3.msra.mxu0 %v215_v16  ;;  %797 = vmatpush3.msra.mxu1 %v215_v16 }
  0x44   : > { %746 = vmatprep.mubr.f32.mxu0 %v211_v17  ;;  %749 = vmatprep.mubr.f32.mxu1 %v213_v18 }
  0x45   : > { %747 = vmatmul.mubr.f32.vlgmr.msra.gmra.mxu0 %v212_v19  ;;  %750 = vmatmul.mubr.f32.vlgmr.msra.gmra.mxu1 %v214_v20 }
 0x105   : > { %v748_v21 = vpop.f32.mrf.mxu0  ;;  %v751_v22 = vpop.f32.mrf.mxu1 }
 0x106   : > { %v326_v27 = vsel %vm316_vm1, %v751_v22, -inf  ;;  %v320_v28 = vsel %vm316_vm1, %v748_v21, -inf }
 0x107   : > { %v297_v23 = vpop.f32.mrf.mxu0  ;;  %v307_v24 = vpop.f32.mrf.mxu1 }
 0x108   : > { %v323_v25 = vsel %vm316_vm1, %v307_v24, -inf  ;;  %v317_v26 = vsel %vm316_vm1, %v297_v23, -inf }
 0x109   : > { %324 = vmax.xlane.f32.xlu1 %v323_v25  ;;  %318 = vmax.xlane.f32.xlu0 %v317_v26 }
 0x10d   : > { %327 = vmax.xlane.f32.xlu1 %v326_v27  ;;  %321 = vmax.xlane.f32.xlu0 %v320_v28 }
 0x192   : > { %v325_v29 = vpop.xlane.xlu1 %324  ;;  %v319_v30 = vpop.xlane.xlu0 %318 }
 0x193   : > { %v331_v31 = vsub.f32 %v307_v24, %v325_v29  ;;  %v329_v32 = vsub.f32 %v297_v23, %v319_v30 }
 0x195   : > { %v333_v33 = vmul.f32 1.442695, %v329_v32  ;;  %v337_v34 = vmul.f32 1.442695, %v331_v31 }
 0x196   : > { %v328_v35 = vpop.xlane.xlu1 %327  ;;  %v322_v36 = vpop.xlane.xlu0 %321 }
 0x197   : > { %v332_v37 = vsub.f32 %v751_v22, %v328_v35  ;;  %v330_v38 = vsub.f32 %v748_v21, %v322_v36  ;;  %881 = vpow2.f32 %v333_v33 }
 0x198   : > { %883 = vpow2.f32 %v337_v34 }
 0x199   : > { %v335_v39 = vmul.f32 1.442695, %v330_v38  ;;  %v339_v40 = vmul.f32 1.442695, %v332_v37 }
 0x19b   : > { %885 = vpow2.f32 %v335_v39 }
 0x19c   : > { %887 = vpow2.f32 %v339_v40 }
 0x1a4   : > { %v882_v41 = vpop.eup %881 }
 0x1a5   : > { %v341_v42 = vsel %vm316_vm1, %v882_v41, 0.0  ;;  %v884_v43 = vpop.eup %883 }
 0x1a6   : > { %342 = vadd.xlane.f32.xlu0 %v341_v42  ;;  %v347_v45 = vsel %vm316_vm1, %v884_v43, 0.0 }
 0x1a8   : > { %v886_v44 = vpop.eup %885 }
 0x1a9   : > { %v344_v46 = vsel %vm316_vm1, %v886_v44, 0.0  ;;  %v888_v47 = vpop.eup %887 }
 0x1aa   : > { %348 = vadd.xlane.f32.xlu0 %v347_v45  ;;  %345 = vadd.xlane.f32.xlu1 %v344_v46  ;;  %v350_v48 = vsel %vm316_vm1, %v888_v47, 0.0 }
 0x1ae   : > { %351 = vadd.xlane.f32.xlu1 %v350_v48 }
 0x22f   : > { %v343_v49 = vpop.xlane.xlu0 %342 }
 0x230   : > { %889 = vrcp.f32 %v343_v49 }
 0x233   : > { %v346_v50 = vpop.xlane.xlu1 %345  ;;  %v349_v51 = vpop.xlane.xlu0 %348 }
 0x234   : > { %891 = vrcp.f32 %v346_v50 }
 0x235   : > { %893 = vrcp.f32 %v349_v51 }
 0x237   : > { %v352_v52 = vpop.xlane.xlu1 %351 }
 0x238   : > { %895 = vrcp.f32 %v352_v52 }
 0x23d   : > { %v890_v53 = vpop.eup %889 }
 0x23e   : > { %v354_v54 = vmul.f32 %v890_v53, %v882_v41 }
 0x241   : > { %v892_v55 = vpop.eup %891 }
 0x242   : > { %v894_v56 = vpop.eup %893  ;;  %v356_v57 = vmul.f32 %v892_v55, %v886_v44  ;;  %364 = sbr.rel (%p668_p1) target bundleno = 605 (0x25d), region = 44 }
 0x243   : > { %v358_v58 = vmul.f32 %v894_v56, %v884_v43 }
 0x245   : > { %v896_v59 = vpop.eup %895 }
 0x246   : > { %v360_v60 = vmul.f32 %v896_v59, %v888_v47 }
 0x247   : > { %v372_v61 = vsel %vm316_vm1, %v354_v54, 0.0  ;;  %v373_v62 = vsel %vm316_vm1, %v356_v57, 0.0  ;;  %v375_v63 = vsel %vm316_vm1, %v358_v58, 0.0  ;;  %367 = vst.msk [vmem:[%s366_s11] sm:$0xff] %vm316_vm1, %v354_v54  ;;  %368 = vst.msk [vmem:[%s366_s11 + $0x8] sm:$0xff] %vm316_vm1, %v356_v57  ;;  %vm386_vm2 = vcmask 253952  }
 0x248   : > { %v374_v0 = vadd.f32 %v373_v62, %v372_v61  ;;  %369 = vst.msk [vmem:[%s366_s11 + $0x10] sm:$0xff] %vm316_vm1, %v358_v58  ;;  %370 = vst.msk [vmem:[%s366_s11 + $0x18] sm:$0xff] %vm316_vm1, %v360_v60  ;;  %v377_v1 = vsel %vm316_vm1, %v360_v60, 0.0  ;;  %v371_v9 = vld [vmem:[#allocation3] sm:$0x1] }
 0x24a   : > { %v376_v2 = vadd.f32 %v375_v63, %v374_v0 }
 0x24c   : > { %v378_v3 = vadd.f32 %v377_v1, %v376_v2 }
 0x24e   : > { %v379_v4 = vrot.slane %v378_v3, 4 }
 0x250   : > { %v380_v5 = vadd.f32 %v379_v4, %v378_v3 }
 0x252   : > { %v381_v6 = vrot.slane %v380_v5, 2 }
 0x254   : > { %v382_v7 = vadd.f32 %v381_v6, %v380_v5 }
 0x256   : > { %v383_v8 = vrot.slane %v382_v7, 1 }
 0x258   : > { %v384_v10 = vadd.f32 %v383_v8, %v382_v7 }
 0x25a   : > { %v385_v11 = vadd.f32 %v384_v10, %v371_v9 }
 0x25c   : > { %387 = vst.msk [vmem:[#allocation3] sm:$0x1] %vm386_vm2, %v385_v11 }
 0x25d PF: > { %p670_p2 = scmp.ne.s32.totalorder %s975_s15, 2 }
 0x25e   : > { %s671_s24 = sshll.u32 (!%p670_p2), %s975_s15, 5 }
 0x25f   : > { %391 = sbr.rel (%p670_p2) target bundleno = 628 (0x274), region = 48  ;;  %s406_s27 = scalar_lea.vmem (!%p670_p2), [#allocation2], %s671_s24 }
 0x264   : > { %v412_v12 = vsel %vm316_vm1, %v354_v54, 0.0  ;;  %407 = vst.msk [vmem:[%s406_s27] sm:$0xff] %vm316_vm1, %v354_v54  ;;  %v994_v14 = vmov 0.0   ;;  %v411_v19 = vld [vmem:[#allocation3] sm:$0x1]  ;;  %vm426_vm3 = vcmask 253952  }
 0x265   : > { %v419_v13 = vrot.slane %v412_v12, 4  ;;  %408 = vst.msk [vmem:[%s406_s27 + $0x8] sm:$0xff] %vm316_vm1, %v994_v14  ;;  %409 = vst.msk [vmem:[%s406_s27 + $0x10] sm:$0xff] %vm316_vm1, %v994_v14 }
 0x266   : > { %410 = vst.msk [vmem:[%s406_s27 + $0x18] sm:$0xff] %vm316_vm1, %v994_v14 }
 0x267   : > { %v420_v15 = vadd.f32 %v419_v13, %v412_v12 }
 0x269   : > { %v421_v16 = vrot.slane %v420_v15, 2 }
 0x26b   : > { %v422_v17 = vadd.f32 %v421_v16, %v420_v15 }
 0x26d   : > { %v423_v18 = vrot.slane %v422_v17, 1 }
 0x26f   : > { %v424_v20 = vadd.f32 %v423_v18, %v422_v17 }
 0x271   : > { %v425_v21 = vadd.f32 %v424_v20, %v411_v19 }
 0x273   : > { %427 = vst.msk [vmem:[#allocation3] sm:$0x1] %vm426_vm3, %v425_v21 }
 0x274 PF: > { %p672_p3 = scmp.ne.s32.totalorder %s979_s16, 1 }
 0x275   : > { %p673_p4 = scmp.ne.s32.totalorder (!%p672_p3), %s975_s15, 0 }
 0x276   : > { %431 = sbr.rel (%p672_p3) target bundleno = 863 (0x35f), region = 52 }
 0x27b   : > { %435 = sbr.rel (%p673_p4) target bundleno = 656 (0x290), region = 56 }
 0x280   : > { %v436_v22 = vld [vmem:[#allocation3] sm:$0x1]  ;;  %vm439_vm4 = vcmask 253952  }
 0x281   : > { %897 = vrcp.f32 %v436_v22 }
 0x28e   : > { %v898_v23 = vpop.eup %897 }
 0x28f   : > { %440 = vst.msk [vmem:[#allocation4] sm:$0x1] %vm439_vm4, %v898_v23 }
 0x290 PF: > { %v461_v24 = vld [vmem:[%s1264_s2 + $0x18] sm:$0xff]  ;;  %v460_v25 = vld [vmem:[%s1264_s2 + $0x10] sm:$0xff]  ;;  %s674_s7 = sshll.u32 %s975_s15, 5  ;;  %v459_v26 = vld [vmem:[%s1264_s2 + $0x8] sm:$0xff]  ;;  %vm462_vm5 = vcmask 261120  }
 0x291   : > { %752 = vmatprep.subr.mxu0 %v461_v24  ;;  %798 = vmatprep.subr.mxu1 %v461_v24  ;;  %s442_s10 = scalar_lea.vmem [#allocation2], %s674_s7  ;;  %v458_v32 = vld [vmem:[%s1264_s2] sm:$0xff] }
 0x292   : > { %753 = vmatpush3.msra.mxu0 %v461_v24  ;;  %802 = vmatpush3.msra.mxu1 %v461_v24  ;;  %v443_v27 = vld [vmem:[%s442_s10] sm:$0xff]  ;;  %v445_v29 = vld [vmem:[%s442_s10 + $0x10] sm:$0xff]  ;;  %v444_v30 = vld [vmem:[%s442_s10 + $0x8] sm:$0xff] }
 0x293   : > { %754 = vmatprep.subr.mxu0 %v460_v25  ;;  %799 = vmatprep.subr.mxu1 %v460_v25  ;;  %v446_v31 = vld [vmem:[%s442_s10 + $0x18] sm:$0xff] }
 0x294   : > { %755 = vmatpush3.msra.mxu0 %v460_v25  ;;  %803 = vmatpush3.msra.mxu1 %v460_v25 }
 0x295   : > { %756 = vmatprep.subr.mxu0 %v459_v26  ;;  %800 = vmatprep.subr.mxu1 %v459_v26 }
 0x296   : > { %v675_v28 = vld [vmem:[#allocation4] ss:$0 sm:$0xff]  ;;  %757 = vmatpush3.msra.mxu0 %v459_v26  ;;  %804 = vmatpush3.msra.mxu1 %v459_v26 }
 0x297   : > { %v454_v33 = vmul.f32 %v675_v28, %v443_v27  ;;  %v456_v34 = vmul.f32 %v675_v28, %v445_v29  ;;  %v455_v35 = vmul.f32 %v675_v28, %v444_v30  ;;  %v457_v36 = vmul.f32 %v675_v28, %v446_v31  ;;  %758 = vmatprep.subr.mxu0 %v458_v32 }
 0x298   : > { %801 = vmatprep.subr.mxu1 %v458_v32  ;;  %759 = vmatpush3.msra.mxu0 %v458_v32 }
 0x299   : > { %805 = vmatpush3.msra.mxu1 %v458_v32  ;;  %760 = vmatprep.mubr.msk.f32.mxu0 %vm462_vm5, %v454_v33 }
 0x29a   : > { %763 = vmatprep.mubr.msk.f32.mxu1 %vm462_vm5, %v456_v34  ;;  %761 = vmatmul.mubr.msk.f32.vlgmr.msra.gmra.mxu0 %vm462_vm5, %v455_v35 }
 0x29b   : > { %764 = vmatmul.mubr.msk.f32.vlgmr.msra.gmra.mxu1 %vm462_vm5, %v457_v36 }
 0x35a   : > { %v762_v37 = vpop.f32.mrf.mxu0 }
 0x35b   : > { %v765_v38 = vpop.f32.mrf.mxu1  ;;  %561 = vst [vmem:[%s1099_s21 + $0x8] sm:$0xff] %v762_v37 }
 0x35c   : > { %563 = vst [vmem:[%s1099_s21 + $0x18] sm:$0xff] %v765_v38  ;;  %v541_v39 = vpop.f32.mrf.mxu0 }
 0x35d   : > { %v551_v40 = vpop.f32.mrf.mxu1  ;;  %560 = vst [vmem:[%s1099_s21] sm:$0xff] %v541_v39 }
 0x35e   : > { %562 = vst [vmem:[%s1099_s21 + $0x10] sm:$0xff] %v551_v40 }
 0x35f PF: > { %s572_s24 = smul.u32 %s975_s15, %s979_s16  ;;  %s579_s27 = sshll.u32 %s1099_s21, 4  ;;  %s1202_s27 = int_to_ptr.vmem [resolvable:$true] %s579_s27 }
 0x360   : > { %s1211_s7 = scalar_lea.sflag [#allocation6], %s186_s4  ;;  %s899_s8 = scalar_lea.vmem %s1202_s27, 512 }
 0x361   : > { %s685_s28 = sshll.u32 %s572_s24, 9  ;;  %p900_p5 = scmp.ne.s32.totalorder %s1202_s27, %s899_s8 }
 0x362   : > { %s1207_s6 = scalar_lea.hbm %s1265_s3, %s685_s28  ;;  %s995_s15 = smov [#allocation5]  }
 0x363   : > { %p901_p7 = pnand %p900_p5, %p1071_p6  ;;  %s903_s16 = sshll.u32 %s995_s15, 4  ;;  %s904_s16 = int_to_ptr.vmem [resolvable:$false] %s903_s16 }
 0x364   : > { %s905_s21 = scalar_lea.vmem %s904_s16, 1024  ;;  %p906_p10 = scmp.lt.s32.totalorder %s1202_s27, %s904_s16 }
 0x365   : > { %p902_p9 = pneg %p901_p7  ;;  %p907_p11 = scmp.lt.s32.totalorder %s905_s21, %s899_s8 }
 0x367   : > { %p908_p12 = por %p907_p11, %p906_p10 }
 0x369   : > { %p909_p13 = pnand %p908_p12, %p902_p9 }
 0x36b   : > { %912 = shalt.err (!%p909_p13)
}
 0x36c   : > { %s913_s4 = scalar_lea.hbm %s1207_s6, 512  ;;  %s917_s20 = scalar_lea.hbm %s1265_s3, 1536 }
 0x36d   : > { %p914_p0 = scmp.ne.s32.totalorder %s1207_s6, %s913_s4  ;;  %p918_p3 = scmp.lt.s32.totalorder %s1207_s6, %s1265_s3 }
 0x36e   : > { %p919_p4 = scmp.lt.s32.totalorder %s917_s20, %s913_s4 }
 0x36f   : > { %p915_p1 = pnand %p914_p0, %p1071_p6 }
 0x370   : > { %p920_p5 = por %p919_p4, %p918_p3 }
 0x371   : > { %p916_p2 = pneg %p915_p1 }
 0x373   : > { %p921_p7 = pnand %p920_p5, %p916_p2 }
 0x375   : > { %924 = shalt.err (!%p921_p7)
}
 0x376   : > { %s996_s28 = smov 128   ;;  %s997_s29 = smov 8  }
 0x377   : > { %806 = dma.vmem_to_hbm [thread:$0]  (%p1071_p6), %s1202_s27, 512, %s1207_s6, %s1211_s7, %s996_s28, %s996_s28, %s997_s29  }
 0x378 PF: > { %p812_p9 = scmp.ge.s32.totalorder %s991_s19, 2  ;;  %s594_s5 = sand.u32 1, %s963_s12  }
 0x379   : > { %s595_s8 = scalar_lea.sflag [#allocation6], %s594_s5 }
 0x37a   : > { %p809_p10 = pnand %p812_p9, %p1078_p8 }
 0x37c   : > { %p810_p11 = pneg %p809_p10 }
 0x37e   : > { %958 = dma.done.wait (%p810_p11), %s595_s8, 512  }
 0x37f   : > { %960 = vsyncadd (%p810_p11), %s595_s8, 4294966784  ;;  %s16_s19 = sadd.s32 1, %s991_s19   ;;  %s1268_s12 = smov %s967_s13 }
 0x380   : > { %p13_p12 = scmp.ge.s32.totalorder %s16_s19, 8   ;;  %s1269_s13 = smov %s971_s14 }
 0x381   : > { %s1270_s14 = smov %s1087_s30  ;;  %s1271_s15 = smov %s983_s17 }
 0x382   : > { %s1272_s16 = smov %s987_s18  ;;  %s1273_s17 = smov %s1276_s22 }
 0x383   : > { %s1274_s18 = smov %s1280_s23  ;;  %15 = sbr.rel (!%p13_p12) target bundleno = 5 (0x5), region = 94 }
 0x388   :  { %600 = vsyncpa [#allocation6], 1 }
 0x389   :  { %602 = vsyncpa [#allocation6 + $0x1], 1 }

</bundles_post_ra>
